<compile_context>
chip_gen: v7x
topology: tpu7x:2x2x1
jax: 0.10.0
libtpu: 0.0.40
codegen_flags: <defaults>
</compile_context>

<pallas_src>
import math
import functools

import jax
import jax.numpy as jnp
from jax import lax
from jax.experimental import pallas as pl
from jax.experimental.pallas import tpu as pltpu


def _mix32(x):
    """splitmix32-style finalizer on uint32 values (pure VPU int ops)."""
    x = x ^ (x >> 16)
    x = x * jnp.uint32(0x7FEB352D)
    x = x ^ (x >> 15)
    x = x * jnp.uint32(0x846CA68B)
    x = x ^ (x >> 16)
    return x


def _pe_kernel(seed_ref, x_ref, pe_ref, o_ref, *, train: bool, p: float):
    # x_ref: (ts, B, D), pe_ref: (ts, D), o_ref: (ts, B, D)
    y = x_ref[...] + pe_ref[...][:, None, :]

    if train and p > 0.0:
        ts, b, d = y.shape  # static block shape
        # Globally unique per-element counter (wraps mod 2^32; fine for hashing).
        row = lax.broadcasted_iota(jnp.int32, y.shape, 0).astype(jnp.uint32)
        col = lax.broadcasted_iota(jnp.int32, y.shape, 1).astype(jnp.uint32)
        lane = lax.broadcasted_iota(jnp.int32, y.shape, 2).astype(jnp.uint32)
        pid = pl.program_id(0).astype(jnp.uint32)
        elem = (pid * jnp.uint32(ts) + row) * jnp.uint32(b * d) \
               + col * jnp.uint32(d) + lane
        seed = seed_ref[0].astype(jnp.uint32) * jnp.uint32(0x9E3779B1)
        bits = _mix32(elem ^ seed)
        # Bernoulli(1 - p) via integer threshold + fused inverted-dropout scale.
        thresh = jnp.uint32(min(int(round(p * 4294967296.0)), 4294967295))
        scale = jnp.float32(1.0 / (1.0 - p))
        y = jnp.where(bits >= thresh, y * scale, jnp.float32(0.0)).astype(y.dtype)

    o_ref[...] = y


def make_positional_encoding_table(d_model: int, max_len: int) -> jnp.ndarray:
    """Same construction as PositionalEncoding.__init__, shape (max_len, d_model)."""
    position = jnp.arange(max_len, dtype=jnp.float32)[:, None]
    div_term = jnp.exp(
        jnp.arange(0, d_model, 2, dtype=jnp.float32) * (-math.log(10000.0) / d_model)
    )
    pe = jnp.zeros((max_len, d_model), dtype=jnp.float32)
    pe = pe.at[:, 0::2].set(jnp.sin(position * div_term))
    pe = pe.at[:, 1::2].set(jnp.cos(position * div_term))
    return pe


# Per-x-tile VMEM budget: with double-buffered input + output this stays well
# under every generation's limit (v7x has only 64 MiB physical VMEM per TC).
_SEQ_TILE_BYTES = 4 * 1024 * 1024
_VMEM_LIMIT_BYTES = 48 * 1024 * 1024   # raise scoped VMEM (v5e default is 16 MiB)


def positional_encoding(x, pe_table, *, dropout_p=0.1, train=False, seed=0):
    """x: (S, B, D) float32; pe_table: (max_len, D) with max_len >= S. Returns (S, B, D)."""
    S, B, D = x.shape
    assert pe_table.shape[0] >= S and pe_table.shape[1] == D

    row_bytes = B * D * x.dtype.itemsize
    ts = max(1, min(S, _SEQ_TILE_BYTES // row_bytes))
    if ts < S:
        # When tiling, keep the pe block's sublane dim a multiple of 8.
        ts = min(S, max(8, (ts // 8) * 8))
    if ts >= S:
        ts = S
        pe_in = pe_table[:S]        # grid == 1: block shape equals full array dims
    else:
        pe_in = pe_table            # index_map selects rows; no wrapper slice/copy

    grid = (pl.cdiv(S, ts),)
    seed_arr = jnp.array([seed], dtype=jnp.int32)
    kernel = functools.partial(_pe_kernel, train=bool(train), p=float(dropout_p))

    return pl.pallas_call(
        kernel,
        out_shape=jax.ShapeDtypeStruct((S, B, D), x.dtype),
        grid_spec=pltpu.PrefetchScalarGridSpec(
            num_scalar_prefetch=1,  # seed lives in SMEM
            grid=grid,
            in_specs=[
                pl.BlockSpec((ts, B, D), lambda i, seed: (i, 0, 0)),  # x tile
                pl.BlockSpec((ts, D), lambda i, seed: (i, 0)),        # pe rows
            ],
            out_specs=pl.BlockSpec((ts, B, D), lambda i, seed: (i, 0, 0)),
        ),
        compiler_params=pltpu.CompilerParams(
            dimension_semantics=("parallel",),      # independent tiles (dual-TC on v7x)
            vmem_limit_bytes=_VMEM_LIMIT_BYTES,
        ),
    )(seed_arr, x, pe_in)


if __name__ == "__main__":
    # Small shapes consistent with the module's forward: (seq=8, batch=2, d_model=32)
    S, B, D = 8, 2, 32
    max_len = 64  # module default is 5000; construction identical, only length differs

    key = jax.random.PRNGKey(0)
    x = jax.random.normal(key, (S, B, D), dtype=jnp.float32)
    pe_table = make_positional_encoding_table(D, max_len)

    ref = x + pe_table[:S][:, None, :]

    # Eval mode: dropout is identity -> must match the pure-JAX reference.
    y_eval = jax.block_until_ready(
        positional_encoding(x, pe_table, dropout_p=0.5, train=False))
    assert jnp.allclose(y_eval, ref, atol=1e-6, rtol=1e-6), "eval-mode mismatch"

    # Train mode: every element must be either 0 or ref * 1/(1-p) (inverted dropout).
    p = 0.5
    y_train = jax.block_until_ready(
        positional_encoding(x, pe_table, dropout_p=p, train=True, seed=1234))
    scale = 1.0 / (1.0 - p)
    ok = jnp.logical_or(
        jnp.abs(y_train) <= 1e-6,
        jnp.isclose(y_train, ref * scale, atol=1e-5, rtol=1e-5),
    )
    assert bool(jnp.all(ok)), "train-mode dropout mismatch"
    kept_frac = float(jnp.mean((jnp.abs(y_train) > 1e-6).astype(jnp.float32)))
    assert 0.0 < kept_frac < 1.0, "degenerate dropout mask"

    print("KERNEL_OK")
</pallas_src>

<mosaic_0001>
module attributes {stable_mosaic.version = 11 : i64} {
  func.func @_pe_kernel(%arg0: i32, %arg1: memref<1xi32, #tpu.memory_space<smem>>, %arg2: memref<8x2x32xf32, #tpu.memory_space<vmem>>, %arg3: memref<8x32xf32, #tpu.memory_space<vmem>>, %arg4: memref<8x2x32xf32, #tpu.memory_space<vmem>>) attributes {dimension_semantics = [#tpu.dimension_semantics<parallel>], iteration_bounds = array<i64: 1>, scalar_prefetch = 1 : i64, scratch_operands = 0 : i64, tpu.core_type = #tpu.core_type<tc>, window_params = [{transform_indices = @transform_0, window_bounds = array<i64: 8, 2, 32>}, {transform_indices = @transform_1, window_bounds = array<i64: 8, 32>}, {transform_indices = @transform_2, window_bounds = array<i64: 8, 2, 32>}]} {
    %c0 = arith.constant 0 : index
    %c0_0 = arith.constant 0 : index
    %c0_1 = arith.constant 0 : index
    %0 = vector.load %arg2[%c0, %c0_0, %c0_1] : memref<8x2x32xf32, #tpu.memory_space<vmem>>, vector<8x2x32xf32>
    %c0_2 = arith.constant 0 : index
    %c0_3 = arith.constant 0 : index
    %1 = vector.load %arg3[%c0_2, %c0_3] : memref<8x32xf32, #tpu.memory_space<vmem>>, vector<8x32xf32>
    %2 = vector.shape_cast %1 : vector<8x32xf32> to vector<8x1x32xf32>
    %3 = vector.broadcast %2 : vector<8x1x32xf32> to vector<8x2x32xf32>
    %4 = arith.addf %0, %3 : vector<8x2x32xf32>
    %c0_4 = arith.constant 0 : index
    %c0_5 = arith.constant 0 : index
    %c0_6 = arith.constant 0 : index
    %5 = vector.load %arg4[%c0_4, %c0_5, %c0_6] : memref<8x2x32xf32, #tpu.memory_space<vmem>>, vector<8x2x32xf32>
    tpu.vector_store %arg4[%c0_4, %c0_5, %c0_6], %4 {strides = array<i32>} : memref<8x2x32xf32, #tpu.memory_space<vmem>>, vector<8x2x32xf32>,
    return
  }
  func.func @transform_0(%arg0: i32, %arg1: memref<1xi32, #tpu.memory_space<smem>>) -> (i32, i32, i32) {
    %c0_i32 = arith.constant 0 : i32
    %c0_i32_0 = arith.constant 0 : i32
    %c0_i32_1 = arith.constant 0 : i32
    return %arg0, %c0_i32, %c0_i32_0 : i32, i32, i32
  }
  func.func @transform_1(%arg0: i32, %arg1: memref<1xi32, #tpu.memory_space<smem>>) -> (i32, i32) {
    %c0_i32 = arith.constant 0 : i32
    %c0_i32_0 = arith.constant 0 : i32
    return %arg0, %c0_i32 : i32, i32
  }
  func.func @transform_2(%arg0: i32, %arg1: memref<1xi32, #tpu.memory_space<smem>>) -> (i32, i32, i32) {
    %c0_i32 = arith.constant 0 : i32
    %c0_i32_0 = arith.constant 0 : i32
    %c0_i32_1 = arith.constant 0 : i32
    return %arg0, %c0_i32, %c0_i32_0 : i32, i32, i32
  }
}

</mosaic_0001>

<bundles_post_ra>
// kernel: tpu_custom_call.1
= control target key start
LH: loop header
LB: loop body
LE: loop exit
PB: predicated region body
PF: predicated region fallthrough
CT: control target
= control target key end

     0   :  { %9 = vsyncpa [#allocation5], 0  ;;  %s328_s0 = inlined_call_operand.<no memory space> [shape: s32[1], index: 0, kind: input, shape index: {}]   ;;  %s329_s1 = inlined_call_operand.hbm [shape: f32[8,2,32], index: 1, kind: input, shape index: {}]   ;;  %s330_s2 = inlined_call_operand.hbm [shape: f32[8,32], index: 2, kind: input, shape index: {}]   ;;  %s331_s3 = inlined_call_operand.hbm [shape: f32[8,2,32], index: 3, kind: output, shape index: {}]  }
   0x1   :  { %10 = vsyncpa [#allocation8], 0 }
   0x2   :  { %11 = vsyncpa [#allocation6], 0  ;;  %s252_s12 = smov [#allocation4]   ;;  %s180_s16 = scalar_lea.hbm %s329_s1, 256 }
   0x3   :  { %s17_s13 = sshll.u32 %s252_s12, 4  ;;  %p181_p0 = scmp.ne.s32.totalorder %s329_s1, %s180_s16  ;;  %s18_s13 = int_to_ptr.vmem [resolvable:$true] %s17_s13 }
   0x4   :  { %p184_p1 = scmp.lt.u32.totalorder %s180_s16, %s329_s1 }
   0x6   :  { %p186_p2 = pnand %p184_p1, %p181_p0 }
   0x8   :  { %189 = shalt.err (!%p186_p2)
}
   0x9   :  { %s190_s20 = scalar_lea.vmem %s18_s13, 256  ;;  %p195_p4 = scmp.lt.s32.totalorder %s18_s13, %s18_s13 }
   0xa   :  { %p191_p3 = scmp.ne.s32.totalorder %s18_s13, %s190_s20  ;;  %p196_p5 = scmp.lt.s32.totalorder %s190_s20, %s190_s20 }
   0xc   :  { %p197_p6 = por %p196_p5, %p195_p4 }
   0xe   :  { %p198_p7 = pnand %p197_p6, %p191_p3 }
  0x10   :  { %201 = shalt.err (!%p198_p7)
}
  0x11   :  { %s253_s21 = smov 32   ;;  %s254_s22 = smov 2  }
  0x12   :  { %23 = dma.hbm_to_vmem [thread:$0]  %s329_s1, 256, %s18_s13, [#allocation5], %s253_s21, %s253_s21, %s254_s22  }
  0x13   :  { %s255_s25 = smov [#allocation7]   ;;  %s202_s29 = scalar_lea.hbm %s330_s2, 128 }
  0x14   :  { %s30_s26 = sshll.u32 %s255_s25, 4  ;;  %p203_p8 = scmp.ne.s32.totalorder %s330_s2, %s202_s29  ;;  %s31_s26 = int_to_ptr.vmem [resolvable:$true] %s30_s26 }
  0x15   :  { %p206_p9 = scmp.lt.u32.totalorder %s202_s29, %s330_s2 }
  0x17   :  { %p208_p10 = pnand %p206_p9, %p203_p8 }
  0x19   :  { %211 = shalt.err (!%p208_p10)
}
  0x1a   :  { %s212_s7 = scalar_lea.vmem %s31_s26, 128  ;;  %p217_p12 = scmp.lt.s32.totalorder %s31_s26, %s31_s26 }
  0x1b   :  { %p213_p11 = scmp.ne.s32.totalorder %s31_s26, %s212_s7  ;;  %p218_p13 = scmp.lt.s32.totalorder %s212_s7, %s212_s7 }
  0x1d   :  { %p219_p0 = por %p218_p13, %p217_p12 }
  0x1f   :  { %p220_p1 = pnand %p219_p0, %p213_p11 }
  0x21   :  { %223 = shalt.err (!%p220_p1)
}
  0x22   :  { %33 = dma.hbm_to_vmem [thread:$0]  %s330_s2, 128, %s31_s26, [#allocation8]  }
  0x23   :  { %246 = dma.done.wait [#allocation5], 256  }
  0x24   :  { %247 = vsyncadd [#allocation5], 4294967040 }
  0x25   :  { %248 = dma.done.wait [#allocation8], 128  }
  0x26   :  { %249 = vsyncadd [#allocation8], 4294967168  ;;  %v54_v0 = vlaneseq  ;;  %v256_v1 = vmov 1966171168   ;;  %v48_v6 = vld [vmem:[#allocation7] sm:$0xff]  ;;  %vm147_vm0 = vcmask 254976  }
  0x27   :  { %v52_v2 = vunpack.c.l.s4 %v256_v1  ;;  %v50_v9 = vcombine.high %v48_v6, %v48_v6  ;;  %v40_v13 = vld [vmem:[#allocation4] sm:$0x3]  ;;  %v41_v18 = vld [vmem:[#allocation4 + $0x2] sm:$0x3]  ;;  %v42_v19 = vld [vmem:[#allocation4 + $0x4] sm:$0x3] }
  0x28   :  { %v55_v3 = vshrl.u32 %v54_v0, 7  ;;  %v44_v25 = vld [vmem:[#allocation4 + $0x8] sm:$0x3]  ;;  %v43_v26 = vld [vmem:[#allocation4 + $0x6] sm:$0x3]  ;;  %s257_s2 = smov [#allocation9]  }
  0x29   :  { %v53_v4 = vunpack.c.0.s8 %v52_v2  ;;  %v45_v33 = vld [vmem:[#allocation4 + $0xa] sm:$0x3]  ;;  %v46_v34 = vld [vmem:[#allocation4 + $0xc] sm:$0x3]  ;;  %v47_v40 = vld [vmem:[#allocation4 + $0xe] sm:$0x3] }
  0x2a   :  { %v101_v8 = vsub.s32 0, %v55_v3  ;;  %s161_s9 = sshll.u32 %s257_s2, 4  ;;  %s162_s9 = int_to_ptr.vmem [resolvable:$true] %s161_s9 }
  0x2b   :  { %v56_v5 = vsub.s32 %v53_v4, %v55_v3  ;;  %s224_s10 = scalar_lea.vmem %s162_s9, 256  ;;  %p229_p3 = scmp.lt.s32.totalorder %s162_s9, %s162_s9 }
  0x2c   :  { %p225_p2 = scmp.ne.s32.totalorder %s162_s9, %s224_s10  ;;  %p230_p4 = scmp.lt.s32.totalorder %s224_s10, %s224_s10 }
  0x2d   :  { %v57_v7 = vrot.slane %v48_v6, %v56_v5  ;;  %v64_v12 = vrot.slane %v50_v9, %v56_v5 }
  0x2e   :  { %p231_p5 = por %p230_p4, %p229_p3 }
  0x2f   :  { %v73_v10 = vrot.slane %v57_v7, %v56_v5  ;;  %v65_v11 = vcombine.high %v57_v7, %v57_v7  ;;  %v80_v17 = vrot.slane %v64_v12, %v56_v5  ;;  %v66_v20 = vcombine.high %v64_v12, %v64_v12 }
  0x30   :  { %p232_p6 = pnand %p231_p5, %p225_p2 }
  0x31   :  { %v102_v14 = vrot.slane %v73_v10, %v101_v8  ;;  %v87_v15 = vrot.slane %v65_v11, %v56_v5  ;;  %v95_v16 = vcombine.high %v73_v10, %v73_v10  ;;  %v118_v27 = vrot.slane %v80_v17, %v101_v8 }
  0x32   :  { %v94_v28 = vrot.slane %v66_v20, %v56_v5  ;;  %v96_v29 = vcombine.high %v80_v17, %v80_v17 }
  0x33   :  { %v139_v21 = vadd.f32 %v102_v14, %v40_v13  ;;  %v106_v22 = vrot.slane %v87_v15, %v101_v8  ;;  %v110_v23 = vrot.slane %v95_v16, %v101_v8  ;;  %v97_v24 = vcombine.high %v87_v15, %v87_v15 }
  0x34   :  { %v143_v35 = vadd.f32 %v118_v27, %v44_v25  ;;  %v122_v36 = vrot.slane %v94_v28, %v101_v8  ;;  %v126_v37 = vrot.slane %v96_v29, %v101_v8  ;;  %v98_v38 = vcombine.high %v94_v28, %v94_v28 }
  0x35   :  { %148 = vst.msk [vmem:[#allocation9] sm:$0x3] %vm147_vm0, %v139_v21  ;;  %v140_v30 = vadd.f32 %v106_v22, %v41_v18  ;;  %v141_v31 = vadd.f32 %v110_v23, %v42_v19  ;;  %v114_v32 = vrot.slane %v97_v24, %v101_v8 }
  0x36   :  { %152 = vst.msk [vmem:[#allocation9 + $0x8] sm:$0x3] %vm147_vm0, %v143_v35  ;;  %v144_v41 = vadd.f32 %v122_v36, %v45_v33  ;;  %v145_v42 = vadd.f32 %v126_v37, %v46_v34  ;;  %v130_v43 = vrot.slane %v98_v38, %v101_v8 }
  0x37   :  { %149 = vst.msk [vmem:[#allocation9 + $0x2] sm:$0x3] %vm147_vm0, %v140_v30  ;;  %150 = vst.msk [vmem:[#allocation9 + $0x4] sm:$0x3] %vm147_vm0, %v141_v31  ;;  %v142_v39 = vadd.f32 %v114_v32, %v43_v26 }
  0x38   :  { %153 = vst.msk [vmem:[#allocation9 + $0xa] sm:$0x3] %vm147_vm0, %v144_v41  ;;  %154 = vst.msk [vmem:[#allocation9 + $0xc] sm:$0x3] %vm147_vm0, %v145_v42  ;;  %v146_v44 = vadd.f32 %v130_v43, %v47_v40 }
  0x39   :  { %151 = vst.msk [vmem:[#allocation9 + $0x6] sm:$0x3] %vm147_vm0, %v142_v39 }
  0x3a   :  { %155 = vst.msk [vmem:[#allocation9 + $0xe] sm:$0x3] %vm147_vm0, %v146_v44 }
  0x3b   :  { %235 = shalt.err (!%p232_p6)
}
  0x3c   :  { %s236_s13 = scalar_lea.hbm %s331_s3, 256 }
  0x3d   :  { %p237_p7 = scmp.ne.s32.totalorder %s331_s3, %s236_s13  ;;  %p240_p8 = scmp.lt.u32.totalorder %s236_s13, %s331_s3 }
  0x3f   :  { %p242_p9 = pnand %p240_p8, %p237_p7 }
  0x41   :  { %245 = shalt.err (!%p242_p9)
}
  0x42   :  { %167 = dma.vmem_to_hbm [thread:$0]  %s162_s9, 256, %s331_s3, [#allocation6], %s253_s21, %s253_s21, %s254_s22  }
  0x43   :  { %250 = dma.done.wait [#allocation6], 256  }
  0x44   :  { %251 = vsyncadd [#allocation6], 4294967040 }
  0x45   :  { %171 = vsyncpa [#allocation5], 1 }
  0x46   :  { %172 = vsyncpa [#allocation8], 1 }
  0x47   :  { %173 = vsyncpa [#allocation6], 1 }

</bundles_post_ra>
